<compile_context>
chip_gen: v7x
topology: tpu7x:2x2x1
jax: 0.10.0
libtpu: 0.0.40
codegen_flags: <defaults>
</compile_context>

<pallas_src>
import functools

import numpy as np
import jax
import jax.numpy as jnp
from jax.experimental import pallas as pl
from jax.experimental.pallas import tpu as pltpu


def _decoder_kernel(*refs, layer_meta, slot):
    """Fused IMU decoder; one grid step = one batch tile.

    refs = (x_ref, W_0, b_0, W_1, b_1, ..., o_ref)
      x_ref : (n_tile, C_in0, L_in0)      NCL input tile
      W_i   : (K_i * C_out_i, C_in_i)     tap-major packed weights
      b_i   : (C_out_i, 1)
      o_ref : (n_tile, C_final, L_final)  NCL output tile
    layer_meta = ((K_i, C_in_i, C_out_i), ...) in layer order.
    slot = per-sample lane slot width (>= L_final, multiple of 128).
    """
    x_ref = refs[0]
    o_ref = refs[-1]
    n_layers = len(layer_meta)
    w_refs = [refs[1 + 2 * i] for i in range(n_layers)]
    b_refs = [refs[2 + 2 * i] for i in range(n_layers)]

    n_tile, c_in0, l_in0 = x_ref.shape
    n_cols = n_tile * slot
    f32 = jnp.float32

    # ---- fold the batch once onto the lane axis: slab (C_in0, n_tile*slot).
    # Sample n occupies columns [n*slot, n*slot + L); the remaining columns of
    # each slot are zero "guard" columns that the tap shifts rely on.
    # TODO(synk): for large batch tiles, replace this unrolled assembly with a
    # lax.fori_loop over a VMEM scratch slab to bound live ranges.
    zgap = jnp.zeros((c_in0, slot - l_in0), f32)
    pieces = []
    for n in range(n_tile):
        pieces.append(x_ref[n].astype(f32))
        pieces.append(zgap)
    slab = jnp.concatenate(pieces, axis=1)

    # Per-slot column index; reused by every layer's guard mask.
    col_in_slot = jax.lax.broadcasted_iota(jnp.int32, (1, n_cols), 1) % slot

    length = l_in0
    for li, (K, c_in, c_out) in enumerate(layer_meta):
        l_out = length + K - 1
        # ONE MXU matmul per layer: (K*C_out, C_in) @ (C_in, n_tile*slot).
        y = jnp.dot(w_refs[li][...], slab, preferred_element_type=jnp.float32)
        # Overlap-add (col2im): K shifted accumulations of C_out-wide slabs.
        # out[:, t] += y_k[:, t - k]; guard columns supply the zeros whenever
        # t - k falls outside [0, length), including across slot boundaries.
        acc = y[0:c_out, :]
        for k in range(1, K):
            y_k = y[k * c_out:(k + 1) * c_out, :]
            acc = acc + jnp.concatenate(
                [jnp.zeros((c_out, k), f32), y_k[:, :n_cols - k]], axis=1)
        acc = acc + b_refs[li][...]                  # (C_out, 1) lane-broadcast bias
        if li < n_layers - 1:
            # ReLU + re-zero the guard columns (next layer's shifts need them).
            acc = jnp.where(col_in_slot < l_out, jnp.maximum(acc, 0.0), 0.0)
        slab = acc
        length = l_out

    # ---- store NCL directly; only the valid columns of each slot are written.
    for n in range(n_tile):
        o_ref[n, :, :] = slab[:, n * slot:n * slot + length].astype(o_ref.dtype)


def imu_decoder_forward(x_ncl, params, *, n_tile=None):
    """Fused forward pass.  x_ncl: (N, C_in, L) PyTorch NCL input (consumed as-is)."""
    N, c_in0, l_in0 = x_ncl.shape

    layer_meta = []
    length = l_in0
    for (w_packed, b_col, K) in params:
        c_out = w_packed.shape[0] // K
        c_in = w_packed.shape[1]
        layer_meta.append((K, c_in, c_out))
        length = length + K - 1     # ConvTranspose1d defaults: L_out = L_in + K - 1
    l_final = length
    c_final = layer_meta[-1][2]

    # One grid step handles the whole (tiny) batch; for large N on v7x use
    # n_tile = N // 2 so the "parallel" grid axis spans both TensorCores.
    if n_tile is None:
        n_tile = N
    assert N % n_tile == 0, "n_tile must divide N"

    # Per-sample lane slot: lane-aligned and >= L_final so every tap shift
    # stays inside its own slot (guard columns always wide enough).
    slot = max(128, ((l_final + 127) // 128) * 128)

    kern = functools.partial(_decoder_kernel,
                             layer_meta=tuple(layer_meta), slot=slot)

    flat_inputs = [x_ncl]
    in_specs = [pl.BlockSpec((n_tile, c_in0, l_in0), lambda i: (i, 0, 0))]
    for (w_packed, b_col, K) in params:
        flat_inputs.extend([w_packed, b_col])
        in_specs.append(pl.BlockSpec(w_packed.shape, lambda i: (0, 0)))
        in_specs.append(pl.BlockSpec(b_col.shape, lambda i: (0, 0)))

    return pl.pallas_call(
        kern,
        grid=(N // n_tile,),
        out_shape=jax.ShapeDtypeStruct((N, c_final, l_final), x_ncl.dtype),
        in_specs=in_specs,
        out_specs=pl.BlockSpec((n_tile, c_final, l_final), lambda i: (i, 0, 0)),
        compiler_params=pltpu.CompilerParams(
            dimension_semantics=("parallel",),   # batch tiles across v7x's 2 TCs
            vmem_limit_bytes=32 * 1024 * 1024,   # explicit; re-derive tiles per gen
        ),
    )(*flat_inputs)


class IMUDecoderPallas:
    """JAX/Pallas port of IMU_Decoder(window, kernels, channels)."""

    def __init__(self, window, kernels, channels, key):
        del window  # unused by the module (matches the PyTorch __init__)
        self.raw_params = []   # PyTorch-layout (C_in, C_out, K) weights (reference)
        self.params = []       # kernel-ready (W_packed (K*C_out, C_in), b (C_out,1), K)
        # Same layer order as the PyTorch module: reversed(range(len(kernels)))
        for i in reversed(range(len(kernels))):
            c_in, c_out, k = channels[i + 1], channels[i], kernels[i]
            key, kw, kb = jax.random.split(key, 3)
            bound = 1.0 / np.sqrt(c_in * k)   # deterministic PyTorch-style init
            w = jax.random.uniform(kw, (c_in, c_out, k), jnp.float32, -bound, bound)
            b = jax.random.uniform(kb, (c_out,), jnp.float32, -bound, bound)
            self.raw_params.append((w, b))
            # Hoisted weight-side packing: rows tap-major, co-minor; no tap flip
            # is needed for the overlap-add (col2im) formulation.
            # TODO(synk): optionally cast to bf16 (keep f32 MXU accumulation) on
            # v6e/v7x if the model tolerates it.
            w_packed = jnp.transpose(w, (2, 1, 0)).reshape(k * c_out, c_in)
            self.params.append((w_packed, b.reshape(c_out, 1), k))

    def __call__(self, x_ncl):
        return imu_decoder_forward(x_ncl, self.params)


def _ref_conv_transpose1d(x, w, b):
    """NumPy reference with PyTorch ConvTranspose1d semantics (NCL input)."""
    N, C_in, L = x.shape
    _, C_out, K = w.shape
    L_out = L + K - 1
    out = np.zeros((N, C_out, L_out), np.float32)
    out += b.reshape(1, C_out, 1)
    for n in range(N):
        for co in range(C_out):
            for ci in range(C_in):
                for k in range(K):
                    out[n, co, k:k + L] += x[n, ci, :] * w[ci, co, k]
    return out


if __name__ == "__main__":
    kernels = [3, 5]
    channels = [4, 8, 16]      # decoder input channels = channels[-1] = 16
    window = 8                 # unused by forward
    batch, seq = 2, 8

    dec = IMUDecoderPallas(window, kernels, channels, jax.random.PRNGKey(1))
    x = jax.random.normal(jax.random.PRNGKey(0), (batch, channels[-1], seq),
                          jnp.float32)

    y = jax.block_until_ready(dec(x))
    # expected output shape: (2, channels[0]=4, seq + sum(k-1) = 8 + 2 + 4 = 14)
    assert y.shape == (batch, channels[0], seq + sum(k - 1 for k in kernels)), y.shape

    # NumPy reference check of the full forward pass.
    cur = np.asarray(x)
    n_layers = len(dec.raw_params)
    for li, (w, b) in enumerate(dec.raw_params):
        cur = _ref_conv_transpose1d(cur, np.asarray(w), np.asarray(b))
        if li < n_layers - 1:
            cur = np.maximum(cur, 0.0)
    assert np.allclose(np.asarray(y), cur, rtol=1e-4, atol=1e-4), \
        "Pallas output does not match reference"

    print("KERNEL_OK")
</pallas_src>

<mosaic_0001>
module attributes {stable_mosaic.version = 11 : i64} {
  func.func @_decoder_kernel(%arg0: i32, %arg1: memref<2x16x8xf32, #tpu.memory_space<vmem>>, %arg2: memref<40x16xf32, #tpu.memory_space<vmem>>, %arg3: memref<8x1xf32, #tpu.memory_space<vmem>>, %arg4: memref<12x8xf32, #tpu.memory_space<vmem>>, %arg5: memref<4x1xf32, #tpu.memory_space<vmem>>, %arg6: memref<2x4x14xf32, #tpu.memory_space<vmem>>) attributes {dimension_semantics = [#tpu.dimension_semantics<parallel>], iteration_bounds = array<i64: 1>, scalar_prefetch = 0 : i64, scratch_operands = 0 : i64, tpu.core_type = #tpu.core_type<tc>, window_params = [{transform_indices = @transform_0, window_bounds = array<i64: 2, 16, 8>}, {pipeline_mode = #tpu.pipeline_mode<synchronous>, transform_indices = @transform_1, window_bounds = array<i64: 40, 16>}, {pipeline_mode = #tpu.pipeline_mode<synchronous>, transform_indices = @transform_2, window_bounds = array<i64: 8, 1>}, {pipeline_mode = #tpu.pipeline_mode<synchronous>, transform_indices = @transform_3, window_bounds = array<i64: 12, 8>}, {pipeline_mode = #tpu.pipeline_mode<synchronous>, transform_indices = @transform_4, window_bounds = array<i64: 4, 1>}, {transform_indices = @transform_5, window_bounds = array<i64: 2, 4, 14>}]} {
    %cst = arith.constant 0.000000e+00 : f32
    %0 = vector.broadcast %cst : f32 to vector<16x120xf32>
    %c0 = arith.constant 0 : index
    %c0_0 = arith.constant 0 : index
    %c0_1 = arith.constant 0 : index
    %1 = vector.load %arg1[%c0, %c0_0, %c0_1] : memref<2x16x8xf32, #tpu.memory_space<vmem>>, vector<1x16x8xf32>
    %2 = vector.shape_cast %1 : vector<1x16x8xf32> to vector<16x8xf32>
    %c1 = arith.constant 1 : index
    %c0_2 = arith.constant 0 : index
    %c0_3 = arith.constant 0 : index
    %3 = vector.load %arg1[%c1, %c0_2, %c0_3] : memref<2x16x8xf32, #tpu.memory_space<vmem>>, vector<1x16x8xf32>
    %4 = vector.shape_cast %3 : vector<1x16x8xf32> to vector<16x8xf32>
    %5 = tpu.concatenate %2, %0, %4, %0 in 1 : vector<16x8xf32>, vector<16x120xf32>, vector<16x8xf32>, vector<16x120xf32> -> vector<16x256xf32>
    %6 = tpu.iota {dimensions = array<i32: 1>} : vector<1x256xi32>
    %c128_i32 = arith.constant 128 : i32
    %c0_i32 = arith.constant 0 : i32
    %7 = arith.cmpi eq, %c128_i32, %c0_i32 : i32
    %c1_i32 = arith.constant 1 : i32
    %8 = arith.select %7, %c1_i32, %c128_i32 : i32
    %9 = vector.broadcast %8 : i32 to vector<1x256xi32>
    %10 = arith.remsi %6, %9 : vector<1x256xi32>
    %c0_i32_4 = arith.constant 0 : i32
    %11 = vector.broadcast %c0_i32_4 : i32 to vector<1x256xi32>
    %12 = arith.cmpi ne, %10, %11 : vector<1x256xi32>
    %c0_i32_5 = arith.constant 0 : i32
    %13 = vector.broadcast %c0_i32_5 : i32 to vector<1x256xi32>
    %14 = arith.cmpi slt, %10, %13 : vector<1x256xi32>
    %c0_i32_6 = arith.constant 0 : i32
    %15 = arith.cmpi slt, %8, %c0_i32_6 : i32
    %16 = vector.broadcast %15 : i1 to vector<1x256xi1>
    %17 = vector.broadcast %16 : vector<1x256xi1> to vector<1x256xi1>
    %18 = arith.xori %14, %17 : vector<1x256xi1>
    %19 = arith.andi %18, %12 : vector<1x256xi1>
    %20 = vector.broadcast %8 : i32 to vector<1x256xi32>
    %21 = arith.addi %10, %20 : vector<1x256xi32>
    %22 = arith.select %19, %21, %10 : vector<1x256xi1>, vector<1x256xi32>
    %c0_7 = arith.constant 0 : index
    %c0_8 = arith.constant 0 : index
    %23 = vector.load %arg2[%c0_7, %c0_8] : memref<40x16xf32, #tpu.memory_space<vmem>>, vector<40x16xf32>
    %cst_9 = arith.constant dense<0.000000e+00> : vector<40x256xf32>
    %24 = tpu.matmul %23, %5, %cst_9 {dimension_numbers = #tpu.dot_dimension_numbers<[1], [0], [0], [1], [0, 0, 1, 1], [], []>} : vector<40x16xf32>, vector<16x256xf32>, vector<40x256xf32> -> vector<40x256xf32>
    %25 = vector.extract_strided_slice %24 {offsets = [0, 0], sizes = [8, 256], strides = [1, 1]} : vector<40x256xf32> to vector<8x256xf32>
    %26 = vector.extract_strided_slice %24 {offsets = [8, 0], sizes = [8, 256], strides = [1, 1]} : vector<40x256xf32> to vector<8x256xf32>
    %cst_10 = arith.constant 0.000000e+00 : f32
    %27 = vector.broadcast %cst_10 : f32 to vector<8x1xf32>
    %28 = vector.extract_strided_slice %26 {offsets = [0, 0], sizes = [8, 255], strides = [1, 1]} : vector<8x256xf32> to vector<8x255xf32>
    %29 = tpu.concatenate %27, %28 in 1 : vector<8x1xf32>, vector<8x255xf32> -> vector<8x256xf32>
    %30 = arith.addf %25, %29 : vector<8x256xf32>
    %31 = vector.extract_strided_slice %24 {offsets = [16, 0], sizes = [8, 256], strides = [1, 1]} : vector<40x256xf32> to vector<8x256xf32>
    %cst_11 = arith.constant 0.000000e+00 : f32
    %32 = vector.broadcast %cst_11 : f32 to vector<8x2xf32>
    %33 = vector.extract_strided_slice %31 {offsets = [0, 0], sizes = [8, 254], strides = [1, 1]} : vector<8x256xf32> to vector<8x254xf32>
    %34 = tpu.concatenate %32, %33 in 1 : vector<8x2xf32>, vector<8x254xf32> -> vector<8x256xf32>
    %35 = arith.addf %30, %34 : vector<8x256xf32>
    %36 = vector.extract_strided_slice %24 {offsets = [24, 0], sizes = [8, 256], strides = [1, 1]} : vector<40x256xf32> to vector<8x256xf32>
    %cst_12 = arith.constant 0.000000e+00 : f32
    %37 = vector.broadcast %cst_12 : f32 to vector<8x3xf32>
    %38 = vector.extract_strided_slice %36 {offsets = [0, 0], sizes = [8, 253], strides = [1, 1]} : vector<8x256xf32> to vector<8x253xf32>
    %39 = tpu.concatenate %37, %38 in 1 : vector<8x3xf32>, vector<8x253xf32> -> vector<8x256xf32>
    %40 = arith.addf %35, %39 : vector<8x256xf32>
    %41 = vector.extract_strided_slice %24 {offsets = [32, 0], sizes = [8, 256], strides = [1, 1]} : vector<40x256xf32> to vector<8x256xf32>
    %cst_13 = arith.constant 0.000000e+00 : f32
    %42 = vector.broadcast %cst_13 : f32 to vector<8x4xf32>
    %43 = vector.extract_strided_slice %41 {offsets = [0, 0], sizes = [8, 252], strides = [1, 1]} : vector<8x256xf32> to vector<8x252xf32>
    %44 = tpu.concatenate %42, %43 in 1 : vector<8x4xf32>, vector<8x252xf32> -> vector<8x256xf32>
    %45 = arith.addf %40, %44 : vector<8x256xf32>
    %c0_14 = arith.constant 0 : index
    %c0_15 = arith.constant 0 : index
    %46 = vector.load %arg3[%c0_14, %c0_15] : memref<8x1xf32, #tpu.memory_space<vmem>>, vector<8x1xf32>
    %47 = vector.broadcast %46 : vector<8x1xf32> to vector<8x256xf32>
    %48 = arith.addf %45, %47 : vector<8x256xf32>
    %c12_i32 = arith.constant 12 : i32
    %49 = vector.broadcast %c12_i32 : i32 to vector<1x256xi32>
    %50 = arith.cmpi slt, %22, %49 : vector<1x256xi32>
    %cst_16 = arith.constant 0.000000e+00 : f32
    %51 = vector.broadcast %cst_16 : f32 to vector<8x256xf32>
    %52 = arith.maximumf %48, %51 : vector<8x256xf32>
    %cst_17 = arith.constant 0.000000e+00 : f32
    %53 = vector.shape_cast %50 : vector<1x256xi1> to vector<1x256xi1>
    %54 = vector.broadcast %53 : vector<1x256xi1> to vector<8x256xi1>
    %55 = vector.broadcast %cst_17 : f32 to vector<8x256xf32>
    %56 = arith.select %54, %52, %55 : vector<8x256xi1>, vector<8x256xf32>
    %c0_18 = arith.constant 0 : index
    %c0_19 = arith.constant 0 : index
    %57 = vector.load %arg4[%c0_18, %c0_19] : memref<12x8xf32, #tpu.memory_space<vmem>>, vector<12x8xf32>
    %cst_20 = arith.constant dense<0.000000e+00> : vector<12x256xf32>
    %58 = tpu.matmul %57, %56, %cst_20 {dimension_numbers = #tpu.dot_dimension_numbers<[1], [0], [0], [1], [0, 0, 1, 1], [], []>} : vector<12x8xf32>, vector<8x256xf32>, vector<12x256xf32> -> vector<12x256xf32>
    %59 = vector.extract_strided_slice %58 {offsets = [0, 0], sizes = [4, 256], strides = [1, 1]} : vector<12x256xf32> to vector<4x256xf32>
    %60 = vector.extract_strided_slice %58 {offsets = [4, 0], sizes = [4, 256], strides = [1, 1]} : vector<12x256xf32> to vector<4x256xf32>
    %cst_21 = arith.constant 0.000000e+00 : f32
    %61 = vector.broadcast %cst_21 : f32 to vector<4x1xf32>
    %62 = vector.extract_strided_slice %60 {offsets = [0, 0], sizes = [4, 255], strides = [1, 1]} : vector<4x256xf32> to vector<4x255xf32>
    %63 = tpu.concatenate %61, %62 in 1 : vector<4x1xf32>, vector<4x255xf32> -> vector<4x256xf32>
    %64 = arith.addf %59, %63 : vector<4x256xf32>
    %65 = vector.extract_strided_slice %58 {offsets = [8, 0], sizes = [4, 256], strides = [1, 1]} : vector<12x256xf32> to vector<4x256xf32>
    %cst_22 = arith.constant 0.000000e+00 : f32
    %66 = vector.broadcast %cst_22 : f32 to vector<4x2xf32>
    %67 = vector.extract_strided_slice %65 {offsets = [0, 0], sizes = [4, 254], strides = [1, 1]} : vector<4x256xf32> to vector<4x254xf32>
    %68 = tpu.concatenate %66, %67 in 1 : vector<4x2xf32>, vector<4x254xf32> -> vector<4x256xf32>
    %69 = arith.addf %64, %68 : vector<4x256xf32>
    %c0_23 = arith.constant 0 : index
    %c0_24 = arith.constant 0 : index
    %70 = vector.load %arg5[%c0_23, %c0_24] : memref<4x1xf32, #tpu.memory_space<vmem>>, vector<4x1xf32>
    %71 = vector.broadcast %70 : vector<4x1xf32> to vector<4x256xf32>
    %72 = arith.addf %69, %71 : vector<4x256xf32>
    %73 = vector.extract_strided_slice %72 {offsets = [0, 0], sizes = [4, 14], strides = [1, 1]} : vector<4x256xf32> to vector<4x14xf32>
    %c0_25 = arith.constant 0 : index
    %c0_26 = arith.constant 0 : index
    %c0_27 = arith.constant 0 : index
    %74 = vector.load %arg6[%c0_25, %c0_26, %c0_27] : memref<2x4x14xf32, #tpu.memory_space<vmem>>, vector<1x4x14xf32>
    %75 = vector.shape_cast %74 : vector<1x4x14xf32> to vector<4x14xf32>
    %76 = vector.shape_cast %73 : vector<4x14xf32> to vector<1x4x14xf32>
    tpu.vector_store %arg6[%c0_25, %c0_26, %c0_27], %76 {strides = array<i32>} : memref<2x4x14xf32, #tpu.memory_space<vmem>>, vector<1x4x14xf32>,
    %77 = vector.extract_strided_slice %72 {offsets = [0, 128], sizes = [4, 14], strides = [1, 1]} : vector<4x256xf32> to vector<4x14xf32>
    %c1_28 = arith.constant 1 : index
    %c0_29 = arith.constant 0 : index
    %c0_30 = arith.constant 0 : index
    %78 = vector.load %arg6[%c1_28, %c0_29, %c0_30] : memref<2x4x14xf32, #tpu.memory_space<vmem>>, vector<1x4x14xf32>
    %79 = vector.shape_cast %78 : vector<1x4x14xf32> to vector<4x14xf32>
    %80 = vector.shape_cast %77 : vector<4x14xf32> to vector<1x4x14xf32>
    tpu.vector_store %arg6[%c1_28, %c0_29, %c0_30], %80 {strides = array<i32>} : memref<2x4x14xf32, #tpu.memory_space<vmem>>, vector<1x4x14xf32>,
    return
  }
  func.func @transform_0(%arg0: i32) -> (i32, i32, i32) {
    %c0_i32 = arith.constant 0 : i32
    %c0_i32_0 = arith.constant 0 : i32
    %c0_i32_1 = arith.constant 0 : i32
    return %arg0, %c0_i32, %c0_i32_0 : i32, i32, i32
  }
  func.func @transform_1(%arg0: i32) -> (i32, i32) {
    %c0_i32 = arith.constant 0 : i32
    %c0_i32_0 = arith.constant 0 : i32
    %c0_i32_1 = arith.constant 0 : i32
    return %c0_i32, %c0_i32_0 : i32, i32
  }
  func.func @transform_2(%arg0: i32) -> (i32, i32) {
    %c0_i32 = arith.constant 0 : i32
    %c0_i32_0 = arith.constant 0 : i32
    %c0_i32_1 = arith.constant 0 : i32
    return %c0_i32, %c0_i32_0 : i32, i32
  }
  func.func @transform_3(%arg0: i32) -> (i32, i32) {
    %c0_i32 = arith.constant 0 : i32
    %c0_i32_0 = arith.constant 0 : i32
    %c0_i32_1 = arith.constant 0 : i32
    return %c0_i32, %c0_i32_0 : i32, i32
  }
  func.func @transform_4(%arg0: i32) -> (i32, i32) {
    %c0_i32 = arith.constant 0 : i32
    %c0_i32_0 = arith.constant 0 : i32
    %c0_i32_1 = arith.constant 0 : i32
    return %c0_i32, %c0_i32_0 : i32, i32
  }
  func.func @transform_5(%arg0: i32) -> (i32, i32, i32) {
    %c0_i32 = arith.constant 0 : i32
    %c0_i32_0 = arith.constant 0 : i32
    %c0_i32_1 = arith.constant 0 : i32
    return %arg0, %c0_i32, %c0_i32_0 : i32, i32, i32
  }
}

</mosaic_0001>

<bundles_post_ra>
// kernel: tpu_custom_call.1
= control target key start
LH: loop header
LB: loop body
LE: loop exit
PB: predicated region body
PF: predicated region fallthrough
CT: control target
= control target key end

     0   :  { %vm26_vm0 = vcmask 64512   ;;  %v439_v5 = vmov 0.0   ;;  %s558_s0 = inlined_call_operand.vmem [shape: f32[2,16,8], index: 0, kind: input, shape index: {}]   ;;  %s559_s1 = inlined_call_operand.vmem [shape: f32[40,16], index: 1, kind: input, shape index: {}]   ;;  %s560_s2 = inlined_call_operand.vmem [shape: f32[8,1], index: 2, kind: input, shape index: {}]   ;;  %s561_s3 = inlined_call_operand.vmem [shape: f32[12,8], index: 3, kind: input, shape index: {}]   ;;  %s562_s4 = inlined_call_operand.vmem [shape: f32[4,1], index: 4, kind: input, shape index: {}]   ;;  %s563_s5 = inlined_call_operand.hbm [shape: f32[2,4,14], index: 5, kind: output, shape index: {}]  }
   0x1   :  { %v383_v0 = vld [vmem:[%s558_s0 + $0x10] sm:$0xff]  ;;  %v384_v1 = vld [vmem:[%s558_s0 + $0x18] sm:$0xff]  ;;  %v21_v2 = vld [vmem:[%s558_s0] sm:$0xff]  ;;  %143 = vmatprep.mubr.f32.mxu0 %v439_v5  ;;  %167 = vmatprep.mubr.f32.mxu1 %v439_v5 }
   0x2   :  { %v398_v3 = vpack.c.bf16 %v384_v1, %v383_v0  ;;  %vm399_vm1 = vmpackc.low %vm26_vm0, %vm26_vm0  ;;  %v22_v4 = vld [vmem:[%s558_s0 + $0x8] sm:$0xff] }
   0x3   :  { %v401_v6 = vpack.c.bf16 %v22_v4, %v21_v2 }
   0x4   :  { %400 = vmatprep.subr.msk.bf16.mxu0 %vm399_vm1, %v398_v3  ;;  %404 = vmatprep.subr.msk.bf16.mxu1 %vm399_vm1, %v398_v3 }
   0x5   :  { %10 = vsyncpa [#allocation3], 0  ;;  %403 = vmatpush1.bf16.msk.msra.mxu0 %vm399_vm1, %v401_v6  ;;  %v58_v7 = vld [vmem:[%s559_s1] sm:$0xff]  ;;  %vm63_vm2 = vcmask 130048   ;;  %405 = vmatpush1.bf16.msk.msra.mxu1 %vm399_vm1, %v401_v6  ;;  %v59_v9 = vld [vmem:[%s559_s1 + $0x8] sm:$0xff]  ;;  %v440_v12 = vmov 0   ;;  %v31_v29 = vlaneseq }
   0x6   :  { %v62_v8 = vld [vmem:[%s559_s1 + $0x20] sm:$0xff]  ;;  %v60_v10 = vld [vmem:[%s559_s1 + $0x10] sm:$0xff]  ;;  %v61_v11 = vld [vmem:[%s559_s1 + $0x18] sm:$0xff]  ;;  %414 = vset.pattern.permute.xlu0 %v440_v12  ;;  %s441_s10 = smov 1   ;;  %s442_s11 = smov 2   ;;  %vm180_vm3 = vcmask 7168  }
   0x7   :  { %v226_v21 = vld [vmem:[%s560_s2] sm:$0xff]  ;;  %s443_s13 = smov 4   ;;  %s444_s14 = smov 3   ;;  %vm193_vm4 = vcmask 15360   ;;  %v32_v33 = vand.u32 127, %v31_v29  ;;  %vm206_vm5 = vcmask 23552  }
   0x8   :  { %389 = vmatmul.mubr.msk.f32.vlgmr.msra.gmra.mrb[0].mxu0 %vm63_vm2, %v58_v7  ;;  %393 = vmatmul.mubr.msk.f32.vlgmr.msra.gmra.mrb[0].mxu1 %vm63_vm2, %v62_v8  ;;  %v355_v24 = vld [vmem:[%s562_s4] sm:$0xf]  ;;  %vm219_vm6 = vcmask 31744   ;;  %v245_v59 = vld [vmem:[%s561_s3 + $0x8] sm:$0xf]  ;;  %vm363_vm9 = vcmask 109568  }
   0x9   :  { %149 = vmatprep.mubr.f32.mxu0 %v439_v5  ;;  %316 = vmatprep.mubr.f32.mxu1 %v439_v5  ;;  %v33_v42 = vadd.s32 128, %v32_v33  ;;  %vm234_vm8 = vcmp.lt.s32.totalorder %v32_v33, 12  ;;  %v244_v58 = vld [vmem:[%s561_s3] sm:$0xff]  ;;  %s445_s3 = smov [#allocation2]  }
   0xa   :  { %s372_s19 = sshll.u32 %s445_s3, 4  ;;  %s373_s19 = int_to_ptr.vmem [resolvable:$true] %s372_s19 }
   0xb   :  { %v45_v51 = vand.u32 127, %v33_v42  ;;  %s415_s20 = scalar_lea.vmem %s373_s19, 128  ;;  %p420_p1 = scmp.lt.s32.totalorder %s373_s19, %s373_s19 }
   0xc   :  { %390 = vmatmul.mubr.msk.f32.gmra.mrb[2].mxu0 %vm63_vm2, %v59_v9  ;;  %p416_p0 = scmp.ne.s32.totalorder %s373_s19, %s415_s20  ;;  %p421_p2 = scmp.lt.s32.totalorder %s415_s20, %s415_s20 }
   0xd   :  { %155 = vmatprep.mubr.f32.mxu0 %v439_v5  ;;  %vm235_vm7 = vcmp.lt.s32.totalorder %v45_v51, 12 }
   0xe   :  { %p422_p3 = por %p421_p2, %p420_p1 }
  0x10   :  { %391 = vmatmul.mubr.msk.f32.gmra.mrb[4].mxu0 %vm63_vm2, %v60_v10  ;;  %p423_p4 = pnand %p422_p3, %p416_p0 }
  0x11   :  { %161 = vmatprep.mubr.f32.mxu0 %v439_v5 }
  0x14   :  { %392 = vmatmul.mubr.msk.f32.gmra.mrb[6].mxu0 %vm63_vm2, %v61_v11 }
  0xdb   :  { %v145_v13 = vpop.f32.mrb[0].mxu0  ;;  %v169_v14 = vpop.f32.mrb[0].mxu1 }
  0xdc   :  { %v147_v15 = vpop.f32.mrb[1].mxu0  ;;  %v171_v16 = vpop.f32.mrb[1].mxu1 }
  0xdf   :  { %v151_v17 = vpop.f32.mrb[2].mxu0 }
  0xe0   :  { %176 = vrot.lane.b32.xlu0 %v151_v17, %s441_s10  ;;  %v153_v18 = vpop.f32.mrb[3].mxu0 }
  0xe3   :  { %v157_v19 = vpop.f32.mrb[4].mxu0 }
  0xe4   :  { %178 = vrot.lane.b32.xlu0 %v153_v18, %s441_s10  ;;  %189 = vrot.lane.b32.xlu1 %v157_v19, %s442_s11  ;;  %v159_v20 = vpop.f32.mrb[5].mxu0 }
  0xe7   :  { %v163_v22 = vpop.f32.mrb[6].mxu0 }
  0xe8   :  { %229 = vperm.xlu0 %414, %v226_v21   ;;  %191 = vrot.lane.b32.xlu1 %v159_v20, %s442_s11  ;;  %v165_v23 = vpop.f32.mrb[7].mxu0 }
  0xec   :  { %215 = vrot.lane.b32.xlu0 %v169_v14, %s443_s13  ;;  %202 = vrot.lane.b32.xlu1 %v163_v22, %s444_s14 }
  0xf0   :  { %358 = vperm.xlu0 %414, %v355_v24   ;;  %204 = vrot.lane.b32.xlu1 %v165_v23, %s444_s14 }
  0xf4   :  { %217 = vrot.lane.b32.xlu1 %v171_v16, %s443_s13 }
 0x152   :  { %v177_v27 = vpop.permute.xlu0 %176 }
 0x153   :  { %v184_v31 = vsel %vm180_vm3, 0.0, %v177_v27 }
 0x154   :  { %v185_v37 = vadd.f32 %v184_v31, %v145_v13 }
 0x156   :  { %v190_v25 = vpop.permute.xlu1 %189  ;;  %v179_v30 = vpop.permute.xlu0 %178 }
 0x157   :  { %v181_v32 = vsel %vm180_vm3, %v177_v27, %v179_v30  ;;  %v197_v35 = vsel %vm193_vm4, 0.0, %v190_v25 }
 0x158   :  { %v186_v38 = vadd.f32 %v181_v32, %v147_v15  ;;  %v198_v43 = vadd.f32 %v197_v35, %v185_v37 }
 0x15a   :  { %v192_v26 = vpop.permute.xlu1 %191 }
 0x15b   :  { %v194_v36 = vsel %vm193_vm4, %v190_v25, %v192_v26 }
 0x15c   :  { %v199_v44 = vadd.f32 %v194_v36, %v186_v38 }
 0x15e   :  { %v203_v28 = vpop.permute.xlu1 %202 }
 0x15f   :  { %v210_v40 = vsel %vm206_vm5, 0.0, %v203_v28 }
 0x160   :  { %v211_v46 = vadd.f32 %v210_v40, %v198_v43 }
 0x162   :  { %v205_v34 = vpop.permute.xlu1 %204 }
 0x163   :  { %v207_v41 = vsel %vm206_vm5, %v203_v28, %v205_v34 }
 0x164   :  { %v212_v47 = vadd.f32 %v207_v41, %v199_v44 }
 0x166   :  { %v218_v45 = vpop.permute.xlu1 %217 }
 0x167   :  { %v230_v39 = vpop.permute.xlu0 %229 }
 0x16b   :  { %v216_v48 = vpop.permute.xlu0 %215 }
 0x16c   :  { %v220_v49 = vsel %vm219_vm6, %v216_v48, %v218_v45  ;;  %v223_v50 = vsel %vm219_vm6, 0.0, %v216_v48 }
 0x16d   :  { %v224_v52 = vadd.f32 %v223_v50, %v211_v46  ;;  %v225_v53 = vadd.f32 %v220_v49, %v212_v47 }
 0x16f   :  { %v232_v54 = vadd.f32 %v230_v39, %v224_v52  ;;  %v233_v55 = vadd.f32 %v230_v39, %v225_v53  ;;  %v359_v2 = vpop.permute.xlu0 %358 }
 0x171   :  { %v236_v56 = vmax.f32 %v232_v54, 0.0  ;;  %v237_v57 = vmax.f32 %v233_v55, 0.0 }
 0x173   :  { %394 = vmatprep.subr.msk.mxu1 %vm235_vm7, %v237_v57 }
 0x174   :  { %395 = vmatpush1.msk.msra.mxu1 %vm234_vm8, %v236_v56 }
 0x175   :  { %396 = vmatmul.mubr.msk.f32.vlgmr.msra.gmra.mrb[2].mxu1 %vm26_vm0, %v244_v58 }
 0x176   :  { %322 = vmatprep.mubr.f32.mxu1 %v439_v5 }
 0x179   :  { %397 = vmatmul.mubr.msk.f32.gmra.mrb[4].mxu1 %vm26_vm0, %v245_v59 }
 0x248   :  { %v318_v60 = vpop.f32.mrb[2].mxu1 }
 0x249   :  { %v331_v61 = vrot.slane %v318_v60, 4  ;;  %v320_v62 = vpop.f32.mrb[3].mxu1 }
 0x24a   :  { %v332_v63 = vrot.slane %v320_v62, 4 }
 0x24b   :  { %333 = vrot.lane.b32.xlu1 %v331_v61, %s441_s10 }
 0x24c   :  { %335 = vrot.lane.b32.xlu0 %v332_v63, %s441_s10  ;;  %v324_v0 = vpop.f32.mrb[4].mxu1 }
 0x24d   :  { %v326_v1 = vpop.f32.mrb[5].mxu1 }
 0x24f   :  { %345 = vrot.lane.b32.xlu1 %v324_v0, %s442_s11 }
 0x250   :  { %347 = vrot.lane.b32.xlu0 %v326_v1, %s442_s11 }
 0x2bd   :  { %v334_v3 = vpop.permute.xlu1 %333 }
 0x2be   :  { %v340_v4 = vsel %vm180_vm3, 0.0, %v334_v3  ;;  %v336_v5 = vpop.permute.xlu0 %335 }
 0x2bf   :  { %v337_v6 = vsel %vm180_vm3, %v334_v3, %v336_v5  ;;  %v341_v7 = vadd.f32 %v340_v4, %v318_v60 }
 0x2c0   :  { %v342_v9 = vadd.f32 %v337_v6, %v320_v62 }
 0x2c1   :  { %v346_v8 = vpop.permute.xlu1 %345 }
 0x2c2   :  { %v352_v10 = vsel %vm193_vm4, 0.0, %v346_v8  ;;  %v348_v11 = vpop.permute.xlu0 %347 }
 0x2c3   :  { %v353_v12 = vadd.f32 %v352_v10, %v341_v7  ;;  %v349_v13 = vsel %vm193_vm4, %v346_v8, %v348_v11 }
 0x2c4   :  { %v354_v14 = vadd.f32 %v349_v13, %v342_v9 }
 0x2c5   :  { %v361_v15 = vadd.f32 %v359_v2, %v353_v12 }
 0x2c6   :  { %v362_v16 = vadd.f32 %v359_v2, %v354_v14 }
 0x2c7   :  { %364 = vst.msk [vmem:[#allocation2] sm:$0xf] %vm363_vm9, %v361_v15 }
 0x2c8   :  { %366 = vst.msk [vmem:[#allocation2 + $0x4] sm:$0xf] %vm363_vm9, %v362_v16 }
 0x2c9   :  { %426 = shalt.err (!%p423_p4)
}
 0x2ca   :  { %s427_s23 = scalar_lea.hbm %s563_s5, 128 }
 0x2cb   :  { %p428_p5 = scmp.ne.s32.totalorder %s563_s5, %s427_s23  ;;  %p431_p6 = scmp.lt.u32.totalorder %s427_s23, %s563_s5 }
 0x2cd   :  { %p433_p7 = pnand %p431_p6, %p428_p5 }
 0x2cf   :  { %436 = shalt.err (!%p433_p7)
}
 0x2d0   :  { %s446_s28 = smov 64  }
 0x2d1   :  { %378 = dma.vmem_to_hbm [thread:$0]  %s373_s19, 128, %s563_s5, [#allocation3], %s446_s28, %s446_s28, %s443_s13  }
 0x2d2   :  { %437 = dma.done.wait [#allocation3], 128  }
 0x2d3   :  { %438 = vsyncadd [#allocation3], 4294967168 }
 0x2d4   :  { %382 = vsyncpa [#allocation3], 1 }

</bundles_post_ra>
